<compile_context>
chip_gen: v7x
topology: tpu7x:2x2x1
jax: 0.10.0
libtpu: 0.0.40
codegen_flags: <defaults>
</compile_context>

<pallas_src>
import functools

import jax
import jax.numpy as jnp
import numpy as np
from jax import lax
from jax.experimental import pallas as pl
from jax.experimental.pallas import tpu as pltpu


_MXU_TARGET_ROWS = 256   # fills v6e/v7x MXU M; two clean passes on v5e's 128.


def _round_up(x, m):
    return ((x + m - 1) // m) * m


def _vmem_budget_bytes():
    """~75% of per-core VMEM (generation-aware); conservative fallback."""
    try:
        return int(pltpu.get_tpu_info().vmem_capacity_bytes * 3 // 4)
    except Exception:
        return 48 * 1024 * 1024


def _const_spec(shape, index_map):
    """Single-buffered BlockSpec for grid-invariant operands (weights/biases)."""
    try:
        return pl.BlockSpec(shape, index_map, pipeline_mode=pl.Buffered(1))
    except (TypeError, ValueError):
        return pl.BlockSpec(shape, index_map)


# ----------------------------- Pallas kernels ------------------------------


def gru_layer_kernel(x_ref, wih_ref, whh_ref, bgi_ref, bgh_ref, lens_ref,
                     out_ref, gi_sc, *, seq_len, batch_tile, hidden_p,
                     gi_chunk, unroll, last_layer):
    """One GRU layer for one batch tile.

    x_ref:    (T*bB, D_in)  time-major slab: rows [t*bB:(t+1)*bB] = timestep t
    wih_ref:  (D_in, 3*Hp)  pre-transposed, gate-padded input weights (r,z,n)
    whh_ref:  (Hp, 3*Hp)    pre-transposed, gate-padded hidden weights
    bgi_ref:  (1, 3*Hp) f32 b_ih (+ b_hh for r,z gates), pre-folded
    bgh_ref:  (1, 3*Hp) f32 b_hh for the n gate only (sits inside r*(...))
    lens_ref: (bB, 1) int32 sequence lengths for this batch tile
    out_ref:  (T*bB, Hp) per-timestep outputs (intermediate layer)
              or (bB, Hp) final hidden state at t=length-1 (last layer)
    gi_sc:    (C*bB, 3*Hp) f32  chunked input-projection scratch
    """
    T, bB, Hp, C = seq_len, batch_tile, hidden_p, gi_chunk
    n_chunks = T // C

    # Hoist loop-invariant loads / broadcasts out of the recurrence.
    wih = wih_ref[...]
    whh = whh_ref[...]
    bgi = bgi_ref[...]
    bgh = jnp.broadcast_to(bgh_ref[...], (bB, 3 * Hp))
    lens = lens_ref[...] if last_layer else None        # (bB, 1) int32
    cdt = whh.dtype                                      # matmul operand dtype

    def chunk_body(c, h):
        # Input projection for C timesteps at once: an MXU-shaped matmul off
        # the serial hidden-state dependency chain, bounded-VMEM scratch.
        row0 = pl.multiple_of(c * (C * bB), C * bB)
        gi_sc[...] = (jnp.dot(x_ref[pl.ds(row0, C * bB), :], wih,
                              preferred_element_type=jnp.float32) + bgi)

        def step(i, h):
            gi = gi_sc[pl.ds(pl.multiple_of(i * bB, bB), bB), :]   # (bB, 3*Hp)
            gh = jnp.dot(h.astype(cdt), whh,
                         preferred_element_type=jnp.float32) + bgh
            # PyTorch GRU gate order: r, z, n (each slab is 128-lane aligned)
            r = jax.nn.sigmoid(gi[:, 0 * Hp:1 * Hp] + gh[:, 0 * Hp:1 * Hp])
            z = jax.nn.sigmoid(gi[:, 1 * Hp:2 * Hp] + gh[:, 1 * Hp:2 * Hp])
            n = jnp.tanh(gi[:, 2 * Hp:3 * Hp] + r * gh[:, 2 * Hp:3 * Hp])
            h_new = (1.0 - z) * n + z * h
            if last_layer:
                # pack_padded_sequence semantics: freeze h once t >= length so
                # the final h equals the hidden state at t = length-1.  No
                # dynamic gather, no OOB risk.
                t = c * C + i
                h_new = jnp.where(t < lens, h_new, h)
            else:
                row = pl.multiple_of(row0 + i * bB, bB)
                out_ref[pl.ds(row, bB), :] = h_new.astype(out_ref.dtype)
            return h_new

        return lax.fori_loop(0, C, step, h, unroll=unroll)

    h0 = jnp.zeros((bB, Hp), jnp.float32)
    h_final = lax.fori_loop(0, n_chunks, chunk_body, h0)

    if last_layer:
        out_ref[...] = h_final.astype(out_ref.dtype)


def linear_kernel(x_ref, w_ref, b_ref, out_ref):
    """out = x @ w + b (one lane-padded row tile)."""
    out_ref[...] = (jnp.dot(x_ref[...], w_ref[...],
                            preferred_element_type=jnp.float32)
                    + b_ref[...]).astype(out_ref.dtype)


# ------------------------------ JAX wrappers --------------------------------


def _gru_layer_call(x_tiles, layer_params, lens_tiles, *, seq_len, batch_tile,
                    hidden_p, gi_chunk, unroll, last_layer, interlayer_dtype,
                    vmem_limit):
    """x_tiles: (nb, T*bB, D_in); lens_tiles: (nb, bB, 1) int32."""
    wih, whh, bgi, bgh = layer_params
    nb = x_tiles.shape[0]
    d_in = x_tiles.shape[-1]
    T, bB, Hp, C = seq_len, batch_tile, hidden_p, gi_chunk

    kernel = functools.partial(gru_layer_kernel, seq_len=T, batch_tile=bB,
                               hidden_p=Hp, gi_chunk=C, unroll=unroll,
                               last_layer=last_layer)

    if last_layer:
        out_shape = jax.ShapeDtypeStruct((nb * bB, Hp), jnp.float32)
        out_spec = pl.BlockSpec((bB, Hp), lambda b: (b, 0))
    else:
        out_shape = jax.ShapeDtypeStruct((nb, T * bB, Hp), interlayer_dtype)
        out_spec = pl.BlockSpec((None, T * bB, Hp), lambda b: (b, 0, 0))

    return pl.pallas_call(
        kernel,
        out_shape=out_shape,
        grid=(nb,),
        in_specs=[
            pl.BlockSpec((None, T * bB, d_in), lambda b: (b, 0, 0)),
            _const_spec((d_in, 3 * Hp), lambda b: (0, 0)),   # wih (invariant)
            _const_spec((Hp, 3 * Hp), lambda b: (0, 0)),     # whh (invariant)
            _const_spec((1, 3 * Hp), lambda b: (0, 0)),      # bgi
            _const_spec((1, 3 * Hp), lambda b: (0, 0)),      # bgh
            pl.BlockSpec((None, bB, 1), lambda b: (b, 0, 0)),
        ],
        out_specs=out_spec,
        scratch_shapes=[
            pltpu.VMEM((C * bB, 3 * Hp), jnp.float32),   # chunked gi scratch
        ],
        compiler_params=pltpu.CompilerParams(
            dimension_semantics=("parallel",),
            vmem_limit_bytes=int(vmem_limit)),
    )(x_tiles, wih, whh, bgi, bgh, lens_tiles)


def _pack_gru_layer(w_ih, w_hh, b_ih, b_hh, in_dim, in_dim_p, h, h_p, w_dtype):
    """PyTorch (3H, d_in)/(3H, H) weights -> transposed, gate-padded blocks."""
    def pack_weight(w, d, d_p):
        out = jnp.zeros((d_p, 3 * h_p), jnp.float32)
        for g in range(3):
            out = out.at[:d, g * h_p:g * h_p + h].set(w[g * h:(g + 1) * h, :].T)
        return out.astype(w_dtype)

    def pack_bias(b):
        out = jnp.zeros((3 * h_p,), jnp.float32)
        for g in range(3):
            out = out.at[g * h_p:g * h_p + h].set(b[g * h:(g + 1) * h])
        return out

    wih_t = pack_weight(jnp.asarray(w_ih, jnp.float32), in_dim, in_dim_p)
    whh_t = pack_weight(jnp.asarray(w_hh, jnp.float32), h, h_p)
    bih_p = pack_bias(jnp.asarray(b_ih, jnp.float32))
    bhh_p = pack_bias(jnp.asarray(b_hh, jnp.float32))
    # Fold b_hh for the r, z gates into the hoisted input-projection bias;
    # keep b_hh_n on the recurrent path (it sits inside r * (W_hn h + b_hn)).
    rz_mask = jnp.zeros((3 * h_p,), jnp.float32).at[:2 * h_p].set(1.0)
    bgi = (bih_p + bhh_p * rz_mask).reshape(1, 3 * h_p)
    bgh = (bhh_p * (1.0 - rz_mask)).reshape(1, 3 * h_p)
    return wih_t, whh_t, bgi, bgh


class EncoderTextPallas:
    """Pallas port of EncoderText.forward (embedding -> GRU -> last state)."""

    def __init__(self, vocab_size, word_dim, embed_size, num_gru_layers, key,
                 batch_tile=None, gi_chunk=8, unroll=4,
                 compute_dtype=jnp.bfloat16):
        self.embed_size = embed_size
        self.word_dim = word_dim
        self.num_layers = num_gru_layers
        self.batch_tile = batch_tile          # None = auto (MXU / VMEM aware)
        self.gi_chunk = gi_chunk
        self.unroll = unroll
        self.compute_dtype = compute_dtype    # matmul operand / interlayer dtype
        self.Hp = _round_up(embed_size, 128)  # 128-lane gate slabs
        self.Dp = _round_up(word_dim, 128)

        keys = jax.random.split(key, 1 + 4 * num_gru_layers)
        # nn.Embedding weight, init_weights(): uniform_(-0.1, 0.1)
        self.embedding = jax.random.uniform(
            keys[0], (vocab_size, word_dim), jnp.float32, -0.1, 0.1)
        self.embedding_padded = jnp.pad(
            self.embedding, ((0, 0), (0, self.Dp - word_dim))
        ).astype(compute_dtype)

        # GRU parameters (PyTorch default: uniform(-1/sqrt(H), 1/sqrt(H)));
        # transposes / padding / bias folding / dtype casts done ONCE here.
        k = 1.0 / float(np.sqrt(embed_size))
        self.gru_params = []       # original (torch-layout) f32 params, for ref
        self.packed_params = []    # kernel-ready params
        for layer in range(num_gru_layers):
            d_in = word_dim if layer == 0 else embed_size
            d_in_p = self.Dp if layer == 0 else self.Hp
            kw = keys[1 + 4 * layer: 1 + 4 * (layer + 1)]
            w_ih = jax.random.uniform(kw[0], (3 * embed_size, d_in),
                                      jnp.float32, -k, k)
            w_hh = jax.random.uniform(kw[1], (3 * embed_size, embed_size),
                                      jnp.float32, -k, k)
            b_ih = jax.random.uniform(kw[2], (3 * embed_size,),
                                      jnp.float32, -k, k)
            b_hh = jax.random.uniform(kw[3], (3 * embed_size,),
                                      jnp.float32, -k, k)
            self.gru_params.append((w_ih, w_hh, b_ih, b_hh))
            self.packed_params.append(
                _pack_gru_layer(w_ih, w_hh, b_ih, b_hh, d_in, d_in_p,
                                embed_size, self.Hp, compute_dtype))

    # ----- batch-tile / VMEM planning ------------------------------------

    def _gru_vmem_bytes(self, bB, T_pad):
        a = jnp.dtype(self.compute_dtype).itemsize
        d_in = max(self.Dp, self.Hp)
        x_blk = 2 * T_pad * bB * d_in * a               # double-buffered input
        out_blk = 2 * T_pad * bB * self.Hp * a          # double-buffered output
        wts = (d_in + self.Hp) * 3 * self.Hp * a        # single-buffered weights
        scratch = self.gi_chunk * bB * 3 * self.Hp * 4  # f32 gi chunk
        return x_blk + out_blk + wts + scratch + (2 << 20)

    def _pick_batch_tile(self, B, T_pad, budget):
        if self.batch_tile is not None:
            return max(8, _round_up(self.batch_tile, 8))
        # Target the MXU M dimension (256 covers v6e/v7x; v5e runs two passes).
        bB = min(_MXU_TARGET_ROWS, _round_up(B, 8))
        # Shrink until the per-tile VMEM footprint fits the budget.
        while bB > 8 and self._gru_vmem_bytes(bB, T_pad) > budget:
            bB = max(8, _round_up(bB // 2, 8))
        # Keep at least two batch tiles so both TensorCores on v7x get work.
        if B >= 64 and _round_up(B, bB) == bB:
            bB = max(8, _round_up((bB + 1) // 2, 8))
        return bB

    # ----------------------------------------------------------------------

    def __call__(self, tokens, lengths):
        # tokens: (B, T) int32; lengths: (B,) int, each in [1, T]
        # (sorted-decreasing as pack_padded_sequence(enforce_sorted=True)
        #  requires, though the kernel itself does not need sorting).
        B, T = tokens.shape
        C = self.gi_chunk
        T_pad = _round_up(T, C)

        budget = _vmem_budget_bytes()
        bB = self._pick_batch_tile(B, T_pad, budget)
        B_pad = _round_up(B, bB)
        nb = B_pad // bB

        tok = jnp.asarray(tokens, jnp.int32)
        tok = jnp.pad(tok, ((0, B_pad - B), (0, T_pad - T)))
        lens = jnp.asarray(lengths, jnp.int32)
        lens = jnp.pad(lens, (0, B_pad - B), constant_values=1)

        # Arrange per-batch-tile, time-major slabs: (nb, T_pad*bB, Dp), bf16.
        tok_tiles = tok.reshape(nb, bB, T_pad).transpose(0, 2, 1)    # (nb,T,bB)
        x = jnp.take(self.embedding_padded, tok_tiles, axis=0)      # (nb,T,bB,Dp)
        x = x.reshape(nb, T_pad * bB, self.Dp)
        lens_tiles = lens.reshape(nb, bB, 1)

        for li, params in enumerate(self.packed_params):
            x = _gru_layer_call(
                x, params, lens_tiles, seq_len=T_pad, batch_tile=bB,
                hidden_p=self.Hp, gi_chunk=C, unroll=self.unroll,
                last_layer=(li == self.num_layers - 1),
                interlayer_dtype=self.compute_dtype,
                vmem_limit=budget)
        # Last layer returned (B_pad, Hp) f32: slice away batch/lane padding.
        return x[:B, :self.embed_size]


class EncoderImagePallas:
    """Projection head of EncoderImage (Linear backbone_dim -> embed_dim).

    # TODO(synk): the pretrained ResNet-50/152 conv backbone has no clean,
    # self-contained Pallas equivalent; this module takes pre-pooled backbone
    # features (B, backbone_dim) as input.
    """

    def __init__(self, backbone_dim, embed_size, key,
                 compute_dtype=jnp.bfloat16):
        self.backbone_dim = backbone_dim
        self.embed_size = embed_size
        self.compute_dtype = compute_dtype
        # Xavier-uniform as in EncoderImage.init_weights(), bias = 0.
        r = float(np.sqrt(6.0) / np.sqrt(backbone_dim + embed_size))
        self.weight = jax.random.uniform(key, (embed_size, backbone_dim),
                                         jnp.float32, -r, r)
        self.bias = jnp.zeros((embed_size,), jnp.float32)
        self.Kp = _round_up(backbone_dim, 128)
        self.Np = _round_up(embed_size, 128)
        self.w_packed = (jnp.zeros((self.Kp, self.Np), jnp.float32)
                         .at[:backbone_dim, :embed_size].set(self.weight.T)
                         ).astype(compute_dtype)
        self.b_packed = jnp.zeros((1, self.Np), jnp.float32
                                  ).at[0, :embed_size].set(self.bias)

    def __call__(self, feats):
        B, K = feats.shape
        row_tile = min(256, _round_up(B, 8))
        B_pad = _round_up(B, row_tile)
        xp = (jnp.zeros((B_pad, self.Kp), self.compute_dtype)
              .at[:B, :K].set(feats.astype(self.compute_dtype)))
        out = pl.pallas_call(
            linear_kernel,
            out_shape=jax.ShapeDtypeStruct((B_pad, self.Np), jnp.float32),
            grid=(B_pad // row_tile,),
            in_specs=[pl.BlockSpec((row_tile, self.Kp), lambda i: (i, 0)),
                      _const_spec((self.Kp, self.Np), lambda i: (0, 0)),
                      _const_spec((1, self.Np), lambda i: (0, 0))],
            out_specs=pl.BlockSpec((row_tile, self.Np), lambda i: (i, 0)),
            compiler_params=pltpu.CompilerParams(
                dimension_semantics=("parallel",),
                vmem_limit_bytes=int(_vmem_budget_bytes())),
        )(xp, self.w_packed, self.b_packed)
        return out[:B, :self.embed_size]


class VSEPallas:
    """Pallas port of VSE.forward: (z_images, z_captions, logit_scale)."""

    def __init__(self, vocab_size, word_dim, embed_size, num_gru_layers,
                 backbone_dim, temperature, key, batch_tile=None,
                 compute_dtype=jnp.bfloat16):
        k_img, k_txt = jax.random.split(key)
        self.image_encoder = EncoderImagePallas(
            backbone_dim, embed_size, k_img, compute_dtype=compute_dtype)
        self.text_encoder = EncoderTextPallas(
            vocab_size, word_dim, embed_size, num_gru_layers, k_txt,
            batch_tile=batch_tile, compute_dtype=compute_dtype)
        self.logit_scale = jnp.asarray(np.log(1.0 / temperature), jnp.float32)

    def __call__(self, image_feats, tokens, lengths):
        z_images = self.image_encoder(image_feats)
        z_captions = self.text_encoder(tokens, lengths)
        return z_images, z_captions, jnp.exp(self.logit_scale)


# ------------------------- pure-JAX reference check -------------------------


def encoder_text_reference(enc, tokens, lengths):
    emb = jnp.take(enc.embedding, tokens, axis=0)        # (B, T, D) f32
    x = emb
    for (w_ih, w_hh, b_ih, b_hh) in enc.gru_params:
        H = w_hh.shape[1]

        def cell(h, x_t, w_ih=w_ih, w_hh=w_hh, b_ih=b_ih, b_hh=b_hh, H=H):
            gi = x_t @ w_ih.T + b_ih
            gh = h @ w_hh.T + b_hh
            r = jax.nn.sigmoid(gi[:, :H] + gh[:, :H])
            z = jax.nn.sigmoid(gi[:, H:2 * H] + gh[:, H:2 * H])
            n = jnp.tanh(gi[:, 2 * H:] + r * gh[:, 2 * H:])
            h_new = (1.0 - z) * n + z * h
            return h_new, h_new

        h0 = jnp.zeros((x.shape[0], H), jnp.float32)
        _, ys = lax.scan(cell, h0, jnp.transpose(x, (1, 0, 2)))
        x = jnp.transpose(ys, (1, 0, 2))
    B = tokens.shape[0]
    return x[jnp.arange(B), lengths - 1, :]


# ----------------------------------- main -----------------------------------


if __name__ == "__main__":
    vocab_size, word_dim, embed_size, num_gru_layers = 50, 32, 32, 2
    backbone_dim = 64
    B, T = 2, 8

    key = jax.random.PRNGKey(0)
    k_tok, k_img, k_model = jax.random.split(key, 3)

    tokens = jax.random.randint(k_tok, (B, T), 0, vocab_size, dtype=jnp.int32)
    lengths = jnp.array([8, 5], dtype=jnp.int32)   # sorted decreasing, >= 1
    image_feats = jax.random.normal(k_img, (B, backbone_dim), jnp.float32)

    # Default performance path: bf16 matmul operands / interlayer activations.
    model = VSEPallas(vocab_size, word_dim, embed_size, num_gru_layers,
                      backbone_dim, temperature=0.07, key=k_model)
    z_img, z_cap, scale = model(image_feats, tokens, lengths)
    jax.block_until_ready((z_img, z_cap, scale))

    ref_cap = encoder_text_reference(model.text_encoder, tokens, lengths)
    ref_img = (image_feats @ model.image_encoder.weight.T
               + model.image_encoder.bias)
    ref_scale = jnp.exp(jnp.asarray(np.log(1.0 / 0.07), jnp.float32))

    assert z_img.shape == (B, embed_size)
    assert z_cap.shape == (B, embed_size)
    assert jnp.allclose(z_img, ref_img, atol=5e-2, rtol=5e-2), \
        "image mismatch (bf16)"
    assert jnp.allclose(z_cap, ref_cap, atol=5e-2, rtol=5e-2), \
        "caption mismatch (bf16)"
    assert jnp.allclose(scale, ref_scale), "logit_scale mismatch"

    # f32 debug path: identical weights, tight check of the kernel structure.
    model_f32 = VSEPallas(vocab_size, word_dim, embed_size, num_gru_layers,
                          backbone_dim, temperature=0.07, key=k_model,
                          compute_dtype=jnp.float32)
    z_img32, z_cap32, _ = model_f32(image_feats, tokens, lengths)
    jax.block_until_ready((z_img32, z_cap32))
    ref_cap32 = encoder_text_reference(model_f32.text_encoder, tokens, lengths)
    ref_img32 = (image_feats @ model_f32.image_encoder.weight.T
                 + model_f32.image_encoder.bias)
    assert jnp.allclose(z_img32, ref_img32, atol=2e-4, rtol=2e-4), \
        "image mismatch (f32)"
    assert jnp.allclose(z_cap32, ref_cap32, atol=2e-4, rtol=2e-4), \
        "caption mismatch (f32)"

    print("KERNEL_OK")
</pallas_src>

<mosaic_0001>
module attributes {stable_mosaic.version = 11 : i64} {
  func.func @linear_kernel(%arg0: i32, %arg1: memref<8x128xbf16, #tpu.memory_space<vmem>>, %arg2: memref<128x128xbf16, #tpu.memory_space<vmem>>, %arg3: memref<1x128xf32, #tpu.memory_space<vmem>>, %arg4: memref<8x128xf32, #tpu.memory_space<vmem>>) attributes {dimension_semantics = [#tpu.dimension_semantics<parallel>], iteration_bounds = array<i64: 1>, scalar_prefetch = 0 : i64, scratch_operands = 0 : i64, tpu.core_type = #tpu.core_type<tc>, window_params = [{transform_indices = @transform_0, window_bounds = array<i64: 8, 128>}, {pipeline_mode = #tpu.pipeline_mode<synchronous>, transform_indices = @transform_1, window_bounds = array<i64: 128, 128>}, {pipeline_mode = #tpu.pipeline_mode<synchronous>, transform_indices = @transform_2, window_bounds = array<i64: 1, 128>}, {transform_indices = @transform_3, window_bounds = array<i64: 8, 128>}]} {
    %c0 = arith.constant 0 : index
    %c0_0 = arith.constant 0 : index
    %0 = vector.load %arg1[%c0, %c0_0] : memref<8x128xbf16, #tpu.memory_space<vmem>>, vector<8x128xbf16>
    %c0_1 = arith.constant 0 : index
    %c0_2 = arith.constant 0 : index
    %1 = vector.load %arg2[%c0_1, %c0_2] : memref<128x128xbf16, #tpu.memory_space<vmem>>, vector<128x128xbf16>
    %cst = arith.constant dense<0.000000e+00> : vector<8x128xf32>
    %2 = tpu.matmul %0, %1, %cst {dimension_numbers = #tpu.dot_dimension_numbers<[1], [0], [0], [1], [0, 0, 1, 1], [], []>} : vector<8x128xbf16>, vector<128x128xbf16>, vector<8x128xf32> -> vector<8x128xf32>
    %c0_3 = arith.constant 0 : index
    %c0_4 = arith.constant 0 : index
    %3 = vector.load %arg3[%c0_3, %c0_4] : memref<1x128xf32, #tpu.memory_space<vmem>>, vector<1x128xf32>
    %4 = vector.broadcast %3 : vector<1x128xf32> to vector<8x128xf32>
    %5 = arith.addf %2, %4 : vector<8x128xf32>
    %c0_5 = arith.constant 0 : index
    %c0_6 = arith.constant 0 : index
    %6 = vector.load %arg4[%c0_5, %c0_6] : memref<8x128xf32, #tpu.memory_space<vmem>>, vector<8x128xf32>
    tpu.vector_store %arg4[%c0_5, %c0_6], %5 {strides = array<i32>} : memref<8x128xf32, #tpu.memory_space<vmem>>, vector<8x128xf32>,
    return
  }
  func.func @transform_0(%arg0: i32) -> (i32, i32) {
    %c0_i32 = arith.constant 0 : i32
    %c0_i32_0 = arith.constant 0 : i32
    return %arg0, %c0_i32 : i32, i32
  }
  func.func @transform_1(%arg0: i32) -> (i32, i32) {
    %c0_i32 = arith.constant 0 : i32
    %c0_i32_0 = arith.constant 0 : i32
    %c0_i32_1 = arith.constant 0 : i32
    return %c0_i32, %c0_i32_0 : i32, i32
  }
  func.func @transform_2(%arg0: i32) -> (i32, i32) {
    %c0_i32 = arith.constant 0 : i32
    %c0_i32_0 = arith.constant 0 : i32
    %c0_i32_1 = arith.constant 0 : i32
    return %c0_i32, %c0_i32_0 : i32, i32
  }
  func.func @transform_3(%arg0: i32) -> (i32, i32) {
    %c0_i32 = arith.constant 0 : i32
    %c0_i32_0 = arith.constant 0 : i32
    return %arg0, %c0_i32 : i32, i32
  }
}

</mosaic_0001>

<bundles_post_ra>
// kernel: tpu_custom_call.1
= control target key start
LH: loop header
LB: loop body
LE: loop exit
PB: predicated region body
PF: predicated region fallthrough
CT: control target
= control target key end

     0   :  { %8 = vsyncpa [#allocation3], 0  ;;  %s369_s0 = inlined_call_operand.hbm [shape: bf16[8,128], index: 0, kind: input, shape index: {}]   ;;  %s370_s1 = inlined_call_operand.hbm [shape: bf16[128,128], index: 1, kind: input, shape index: {}]   ;;  %s371_s2 = inlined_call_operand.vmem [shape: f32[1,128], index: 2, kind: input, shape index: {}]   ;;  %s372_s3 = inlined_call_operand.hbm [shape: f32[8,128], index: 3, kind: output, shape index: {}]  }
   0x1   :  { %9 = vsyncpa [#allocation6], 0 }
   0x2   :  { %10 = vsyncpa [#allocation4], 0  ;;  %s296_s12 = smov [#allocation2]   ;;  %s297_s14 = smov [#allocation5]  }
   0x3   :  { %s17_s13 = sshll.u32 %s296_s12, 4  ;;  %s26_s15 = sshll.u32 %s297_s14, 4  ;;  %s18_s13 = int_to_ptr.vmem [resolvable:$true] %s17_s13  ;;  %s323_s15 = int_to_ptr.vmem [resolvable:$true] %s26_s15 }
   0x4   :  { %s224_s18 = scalar_lea.hbm %s369_s0, 64 }
   0x5   :  { %p225_p0 = scmp.ne.s32.totalorder %s369_s0, %s224_s18  ;;  %p228_p1 = scmp.lt.u32.totalorder %s224_s18, %s369_s0 }
   0x7   :  { %p230_p2 = pnand %p228_p1, %p225_p0 }
   0x9   :  { %233 = shalt.err (!%p230_p2)
}
   0xa   :  { %s234_s23 = scalar_lea.vmem %s18_s13, 64  ;;  %p239_p4 = scmp.lt.s32.totalorder %s18_s13, %s18_s13 }
   0xb   :  { %p235_p3 = scmp.ne.s32.totalorder %s18_s13, %s234_s23  ;;  %p240_p5 = scmp.lt.s32.totalorder %s234_s23, %s234_s23 }
   0xd   :  { %p241_p6 = por %p240_p5, %p239_p4 }
   0xf   :  { %p242_p7 = pnand %p241_p6, %p235_p3 }
  0x11   :  { %245 = shalt.err (!%p242_p7)
}
  0x12   :  { %20 = dma.hbm_to_vmem [thread:$0]  %s369_s0, 64, %s18_s13, [#allocation3]  }
  0x13   :  { %s246_s28 = scalar_lea.hbm %s370_s1, 1024 }
  0x14   :  { %p247_p8 = scmp.ne.s32.totalorder %s370_s1, %s246_s28  ;;  %p250_p9 = scmp.lt.u32.totalorder %s246_s28, %s370_s1 }
  0x16   :  { %p252_p10 = pnand %p250_p9, %p247_p8 }
  0x18   :  { %255 = shalt.err (!%p252_p10)
}
  0x19   :  { %s256_s6 = scalar_lea.vmem %s323_s15, 1024  ;;  %p261_p12 = scmp.lt.s32.totalorder %s323_s15, %s323_s15 }
  0x1a   :  { %p257_p11 = scmp.ne.s32.totalorder %s323_s15, %s256_s6  ;;  %p262_p13 = scmp.lt.s32.totalorder %s256_s6, %s256_s6 }
  0x1c   :  { %p263_p0 = por %p262_p13, %p261_p12 }
  0x1e   :  { %p264_p1 = pnand %p263_p0, %p257_p11 }
  0x20   :  { %267 = shalt.err (!%p264_p1)
}
  0x21   :  { %s298_s0 = smov 64   ;;  %s299_s7 = smov 4  }
  0x22   :  { %32 = dma.hbm_to_vmem [thread:$0]  %s370_s1, 1024, %s323_s15, [#allocation6], %s298_s0, %s298_s0, %s299_s7  }
  0x23   :  { %290 = dma.done.wait [#allocation3], 64  }
  0x24   :  { %291 = vsyncadd [#allocation3], 4294967232 }
  0x25   :  { %292 = dma.done.wait [#allocation6], 1024  }
  0x26   :  { %293 = vsyncadd [#allocation6], 4294966272  ;;  %v300_v0 = vmov 0.0   ;;  %vm301_vm0 = vmmov 0   ;;  %v216_v1 = vld [vmem:[#allocation5] sm:$0xff]   ;;  %v217_v2 = vld [vmem:[#allocation5 + $0x8] sm:$0xff]  }
  0x27   :  { %189 = vmatprep.subr.bf16.mxu0 %v300_v0  ;;  %205 = vmatprep.mubr.msk.bf16.mxu0 %vm301_vm0, %v300_v0  ;;  %v218_v3 = vld [vmem:[#allocation5 + $0x10] sm:$0xff]   ;;  %v219_v4 = vld [vmem:[#allocation5 + $0x18] sm:$0xff]   ;;  %v220_v5 = vld [vmem:[#allocation5 + $0x20] sm:$0xff]   ;;  %s302_s11 = smov [#allocation7]  }
  0x28   :  { %190 = vmatpush3.bf16.msra.mxu0 %v216_v1  ;;  %v221_v6 = vld [vmem:[#allocation5 + $0x28] sm:$0xff]   ;;  %v222_v7 = vld [vmem:[#allocation5 + $0x30] sm:$0xff]   ;;  %v223_v8 = vld [vmem:[#allocation5 + $0x38] sm:$0xff]   ;;  %s161_s12 = sshll.u32 %s302_s11, 4  ;;  %s162_s12 = int_to_ptr.vmem [resolvable:$true] %s161_s12 }
  0x29   :  { %191 = vmatprep.subr.bf16.mxu0 %v300_v0  ;;  %v42_v9 = vld [vmem:[#allocation2] sm:$0xf]  ;;  %s268_s13 = scalar_lea.vmem %s162_s12, 128  ;;  %p273_p3 = scmp.lt.s32.totalorder %s162_s12, %s162_s12 }
  0x2a   :  { %v171_v10 = vld [vmem:[%s371_s2] ss:$0 sm:$0xff]  ;;  %p269_p2 = scmp.ne.s32.totalorder %s162_s12, %s268_s13  ;;  %p274_p4 = scmp.lt.s32.totalorder %s268_s13, %s268_s13 }
  0x2c   :  { %192 = vmatpush3.bf16.msra.mxu0 %v217_v2  ;;  %p275_p5 = por %p274_p4, %p273_p3 }
  0x2d   :  { %193 = vmatprep.subr.bf16.mxu0 %v300_v0 }
  0x2e   :  { %p276_p6 = pnand %p275_p5, %p269_p2 }
  0x30   :  { %194 = vmatpush3.bf16.msra.mxu0 %v218_v3 }
  0x31   :  { %195 = vmatprep.subr.bf16.mxu0 %v300_v0 }
  0x34   :  { %196 = vmatpush3.bf16.msra.mxu0 %v219_v4 }
  0x35   :  { %197 = vmatprep.subr.bf16.mxu0 %v300_v0 }
  0x38   :  { %198 = vmatpush3.bf16.msra.mxu0 %v220_v5 }
  0x39   :  { %199 = vmatprep.subr.bf16.mxu0 %v300_v0 }
  0x3c   :  { %200 = vmatpush3.bf16.msra.mxu0 %v221_v6 }
  0x3d   :  { %201 = vmatprep.subr.bf16.mxu0 %v300_v0 }
  0x40   :  { %202 = vmatpush3.bf16.msra.mxu0 %v222_v7 }
  0x41   :  { %203 = vmatprep.subr.bf16.mxu0 %v300_v0 }
  0x44   :  { %204 = vmatpush3.bf16.msra.mxu0 %v223_v8 }
  0x47   :  { %206 = vmatmul.mubr.bf16.vlgmr.msra.gmra.mrb[0].mxu0 %v42_v9 }
 0x11a   :  { %v148_v11 = vpop.f32.mrb[0].mxu0 }
 0x11b   :  { %v149_v12 = vadd.f32 %v171_v10, %v148_v11  ;;  %v207_v13 = vpop.f32.mrb[1].mxu0 }
 0x11c   :  { %v151_v14 = vpop.f32.mrb[2].mxu0 }
 0x11d   :  { %154 = vst [vmem:[#allocation7] sm:$0xff] %v149_v12  ;;  %v208_v15 = vpop.f32.mrb[3].mxu0 }
 0x11e   :  { %279 = shalt.err (!%p276_p6)
}
 0x11f   :  { %s280_s2 = scalar_lea.hbm %s372_s3, 128 }
 0x120   :  { %p281_p7 = scmp.ne.s32.totalorder %s372_s3, %s280_s2  ;;  %p284_p8 = scmp.lt.u32.totalorder %s280_s2, %s372_s3 }
 0x122   :  { %p286_p9 = pnand %p284_p8, %p281_p7 }
 0x124   :  { %289 = shalt.err (!%p286_p9)
}
 0x125   :  { %164 = dma.vmem_to_hbm [thread:$0]  %s162_s12, 128, %s372_s3, [#allocation4]  }
 0x126   :  { %294 = dma.done.wait [#allocation4], 128  }
 0x127   :  { %295 = vsyncadd [#allocation4], 4294967168 }
 0x128   :  { %168 = vsyncpa [#allocation3], 1 }
 0x129   :  { %169 = vsyncpa [#allocation6], 1 }
 0x12a   :  { %170 = vsyncpa [#allocation4], 1 }

</bundles_post_ra>
